<compile_context>
chip_gen: v7x
topology: tpu7x:2x2x1
jax: 0.10.0
libtpu: 0.0.40
codegen_flags: <defaults>
</compile_context>

<pallas_src>
import functools

import numpy as np
import jax
import jax.numpy as jnp
from jax.experimental import pallas as pl
from jax.experimental.pallas import tpu as pltpu


# ---------------------------------------------------------------- kernel -----

def channel_attention_kernel(x_ref, w1_ref, b1_ref, w2_ref, b2_ref, o_ref):
    # x_ref : (Bt, N, C)   batch tile, C on the lane axis (bf16 or f32)
    # w1_ref: (C, M)   b1_ref: (1, M)   fused subnet -> memory-bank (scale folded in)
    # w2_ref: (M, C)   b2_ref: (1, C)   fused memory-bank -> upnet
    xf = x_ref[...].astype(jnp.float32)                                  # (Bt, N, C)

    # AdaptiveAvgPool1d(1) over the token axis, accumulated in f32.
    y = jnp.mean(xf, axis=1)                                             # (Bt, C)

    # softmax(((y @ Ws^T + bs) @ mb) * scale)  ==  softmax(y @ W1 + b1)
    f1 = jnp.dot(y, w1_ref[...],
                 preferred_element_type=jnp.float32) + b1_ref[...]       # (Bt, M)
    f1 = f1 - jnp.max(f1, axis=-1, keepdims=True)
    ef = jnp.exp(f1)
    attn = ef * pl.reciprocal(jnp.sum(ef, axis=-1, keepdims=True),
                              approx=True)                               # (Bt, M)

    # sigmoid((attn @ mb^T) @ Wu^T + bu)  ==  sigmoid(attn @ W2 + b2)
    z = jnp.dot(attn, w2_ref[...],
                preferred_element_type=jnp.float32) + b2_ref[...]        # (Bt, C)
    gate = pl.reciprocal(1.0 + jnp.exp(-z), approx=True)                 # (Bt, C)

    # Per-channel gate broadcast over all tokens; store in the I/O dtype.
    o_ref[...] = (xf * gate[:, None, :]).astype(o_ref.dtype)


# ------------------------------------------------------------- call wrapper --

def _pick_batch_tile(B, N, C, itemsize, vmem_budget_bytes=24 * 1024 * 1024):
    """Largest Bt that (a) keeps double-buffered in+out under the budget,
    (b) leaves >= 2 grid steps when B >= 2 (v7x megacore), (c) divides B."""
    per_sample = N * C * itemsize
    bt = max(1, vmem_budget_bytes // (4 * per_sample))   # in + out, double-buffered
    if B >= 2:
        bt = min(bt, max(1, B // 2))
    bt = int(min(bt, B))
    while B % bt != 0:
        bt -= 1
    return bt


def channel_attention(x, params):
    B, N, C = x.shape
    M = params['w1'].shape[1]
    itemsize = jnp.dtype(x.dtype).itemsize

    Bt = _pick_batch_tile(B, N, C, itemsize)
    grid = (B // Bt,)

    # Explicit VMEM limit with headroom (sized so it also fits v7x's 64 MiB).
    slab_bytes = 4 * Bt * N * C * itemsize                 # in + out, double-buffered
    weight_bytes = 2 * 4 * (C * M + M * C + M + C)         # resident f32 weights (x2 buf)
    vmem_limit = int(min(64 * 1024 * 1024,
                         max(16 * 1024 * 1024, 2 * slab_bytes + weight_bytes)))

    def const_spec(shape):
        nd = len(shape)
        return pl.BlockSpec(tuple(shape), lambda b, _nd=nd: (0,) * _nd)

    # Advisory cost hint for the XLA scheduler.
    flops = B * (2 * N * C + 2 * C * M + 2 * M * C + 6 * M + 4 * C + N * C)
    bytes_accessed = 2 * B * N * C * itemsize + 4 * (C * M + M * C + M + C)
    transcendentals = B * (M + C)

    return pl.pallas_call(
        channel_attention_kernel,
        out_shape=jax.ShapeDtypeStruct((B, N, C), x.dtype),
        grid=grid,
        in_specs=[
            pl.BlockSpec((Bt, N, C), lambda b: (b, 0, 0)),   # x (Bt samples / step)
            const_spec(params['w1'].shape),                  # (C, M), resident
            const_spec(params['b1'].shape),                  # (1, M)
            const_spec(params['w2'].shape),                  # (M, C), resident
            const_spec(params['b2'].shape),                  # (1, C)
        ],
        out_specs=pl.BlockSpec((Bt, N, C), lambda b: (b, 0, 0)),
        compiler_params=pltpu.CompilerParams(
            dimension_semantics=("parallel",),               # megacore split on v7x
            vmem_limit_bytes=vmem_limit),
        cost_estimate=pl.CostEstimate(flops=flops,
                                      transcendentals=transcendentals,
                                      bytes_accessed=bytes_accessed),
        # TODO(synk): add input_output_aliases={0: 0} when the caller donates x.
    )(x, params['w1'], params['b1'], params['w2'], params['b2'])


# ----------------------------------------------------------------- params ----

def init_params(key, C, squeeze_factor, M):
    LD = C // squeeze_factor
    ks = jax.random.split(key, 5)
    raw = {
        # nn.Linear(num_feat, num_feat // squeeze_factor): weight (LD, C), bias (LD,)
        'w_sub': jax.random.normal(ks[0], (LD, C), jnp.float32) / np.sqrt(C),
        'b_sub': jax.random.normal(ks[1], (LD,), jnp.float32) * 0.1,
        # nn.Linear(low_dim, num_feat): weight (C, LD), bias (C,)
        'w_up': jax.random.normal(ks[2], (C, LD), jnp.float32) / np.sqrt(LD),
        'b_up': jax.random.normal(ks[3], (C,), jnp.float32) * 0.1,
        # memory bank parameter: torch.randn(low_dim, memory_blocks)
        'mb': jax.random.normal(ks[4], (LD, M), jnp.float32),
    }
    scale = float(int(LD)) ** (-0.5)                         # matches int(low_dim)**-0.5
    fused = {
        'w1': (raw['w_sub'].T @ raw['mb']) * scale,          # (C, M)
        'b1': (raw['b_sub'] @ raw['mb']).reshape(1, M) * scale,
        'w2': raw['mb'].T @ raw['w_up'].T,                   # (M, C)
        'b2': raw['b_up'].reshape(1, C),
    }
    return raw, fused


# -------------------------------------------------------------- reference ----

def reference(x, raw, low_dim):
    y = jnp.mean(x, axis=1)                                            # (B, C)
    low = y @ raw['w_sub'].T + raw['b_sub']                            # (B, LD)
    f1 = low @ raw['mb']                                               # (B, M)
    attn = jax.nn.softmax(f1 * (int(low_dim) ** (-0.5)), axis=-1)
    y1 = attn @ raw['mb'].T                                            # (B, LD)
    y2 = jax.nn.sigmoid(y1 @ raw['w_up'].T + raw['b_up'])              # (B, C)
    return x * y2[:, None, :]


# ------------------------------------------------------------------- main ----

if __name__ == "__main__":
    B, N, C = 2, 64, 128          # (batch, tokens, num_feat)
    squeeze_factor, M = 16, 128   # low_dim = 8, memory_blocks = 128
    LD = C // squeeze_factor

    key = jax.random.PRNGKey(0)
    kx, kp = jax.random.split(key)
    x32 = jax.random.normal(kx, (B, N, C), jnp.float32)
    raw, fused = init_params(kp, C, squeeze_factor, M)

    # bf16 I/O (kernel is HBM-bandwidth bound); all in-kernel math stays f32.
    x = x32.astype(jnp.bfloat16)

    out = channel_attention(x, fused)
    out = jax.block_until_ready(out)

    ref = reference(x.astype(jnp.float32), raw, LD)
    assert out.shape == (B, N, C) and out.dtype == jnp.bfloat16
    out_f = np.asarray(out, dtype=np.float32)
    ref_f = np.asarray(ref, dtype=np.float32)
    err = float(np.max(np.abs(out_f - ref_f)))
    assert np.allclose(out_f, ref_f, rtol=5e-2, atol=1e-2), err

    print("KERNEL_OK")
</pallas_src>

<mosaic_0001>
module attributes {stable_mosaic.version = 11 : i64} {
  func.func @channel_attention_kernel(%arg0: i32, %arg1: memref<1x64x128xbf16, #tpu.memory_space<vmem>>, %arg2: memref<128x128xf32, #tpu.memory_space<vmem>>, %arg3: memref<1x128xf32, #tpu.memory_space<vmem>>, %arg4: memref<128x128xf32, #tpu.memory_space<vmem>>, %arg5: memref<1x128xf32, #tpu.memory_space<vmem>>, %arg6: memref<1x64x128xbf16, #tpu.memory_space<vmem>>) attributes {dimension_semantics = [#tpu.dimension_semantics<parallel>], iteration_bounds = array<i64: 2>, scalar_prefetch = 0 : i64, scratch_operands = 0 : i64, tpu.core_type = #tpu.core_type<tc>, window_params = [{transform_indices = @transform_0, window_bounds = array<i64: 1, 64, 128>}, {pipeline_mode = #tpu.pipeline_mode<synchronous>, transform_indices = @transform_1, window_bounds = array<i64: 128, 128>}, {pipeline_mode = #tpu.pipeline_mode<synchronous>, transform_indices = @transform_2, window_bounds = array<i64: 1, 128>}, {pipeline_mode = #tpu.pipeline_mode<synchronous>, transform_indices = @transform_3, window_bounds = array<i64: 128, 128>}, {pipeline_mode = #tpu.pipeline_mode<synchronous>, transform_indices = @transform_4, window_bounds = array<i64: 1, 128>}, {transform_indices = @transform_5, window_bounds = array<i64: 1, 64, 128>}]} {
    %c0 = arith.constant 0 : index
    %c0_0 = arith.constant 0 : index
    %c0_1 = arith.constant 0 : index
    %0 = vector.load %arg1[%c0, %c0_0, %c0_1] : memref<1x64x128xbf16, #tpu.memory_space<vmem>>, vector<1x64x128xbf16>
    %1 = arith.extf %0 : vector<1x64x128xbf16> to vector<1x64x128xf32>
    %cst = arith.constant dense<0.000000e+00> : vector<1x128xf32>
    %2 = vector.multi_reduction <add>, %1, %cst [1] : vector<1x64x128xf32> to vector<1x128xf32>
    %cst_2 = arith.constant 6.400000e+01 : f32
    %3 = vector.broadcast %cst_2 : f32 to vector<1x128xf32>
    %4 = arith.divf %2, %3 : vector<1x128xf32>
    %c0_3 = arith.constant 0 : index
    %c0_4 = arith.constant 0 : index
    %5 = vector.load %arg2[%c0_3, %c0_4] : memref<128x128xf32, #tpu.memory_space<vmem>>, vector<128x128xf32>
    %cst_5 = arith.constant dense<0.000000e+00> : vector<1x128xf32>
    %6 = tpu.matmul %4, %5, %cst_5 {dimension_numbers = #tpu.dot_dimension_numbers<[1], [0], [0], [1], [0, 0, 1, 1], [], []>} : vector<1x128xf32>, vector<128x128xf32>, vector<1x128xf32> -> vector<1x128xf32>
    %c0_6 = arith.constant 0 : index
    %c0_7 = arith.constant 0 : index
    %7 = vector.load %arg3[%c0_6, %c0_7] : memref<1x128xf32, #tpu.memory_space<vmem>>, vector<1x128xf32>
    %8 = arith.addf %6, %7 : vector<1x128xf32>
    %cst_8 = arith.constant dense<0xFF800000> : vector<1xf32>
    %9 = vector.multi_reduction <maximumf>, %8, %cst_8 [1] : vector<1x128xf32> to vector<1xf32>
    %10 = vector.shape_cast %9 : vector<1xf32> to vector<1x1xf32>
    %11 = vector.broadcast %10 : vector<1x1xf32> to vector<1x128xf32>
    %12 = arith.subf %8, %11 : vector<1x128xf32>
    %13 = math.exp %12 : vector<1x128xf32>
    %cst_9 = arith.constant dense<0.000000e+00> : vector<1xf32>
    %14 = vector.multi_reduction <add>, %13, %cst_9 [1] : vector<1x128xf32> to vector<1xf32>
    %15 = vector.shape_cast %14 : vector<1xf32> to vector<1x1xf32>
    %16 = tpu.reciprocal %15 {approx = true} : vector<1x1xf32> -> vector<1x1xf32>
    %17 = vector.broadcast %16 : vector<1x1xf32> to vector<1x128xf32>
    %18 = arith.mulf %13, %17 : vector<1x128xf32>
    %c0_10 = arith.constant 0 : index
    %c0_11 = arith.constant 0 : index
    %19 = vector.load %arg4[%c0_10, %c0_11] : memref<128x128xf32, #tpu.memory_space<vmem>>, vector<128x128xf32>
    %cst_12 = arith.constant dense<0.000000e+00> : vector<1x128xf32>
    %20 = tpu.matmul %18, %19, %cst_12 {dimension_numbers = #tpu.dot_dimension_numbers<[1], [0], [0], [1], [0, 0, 1, 1], [], []>} : vector<1x128xf32>, vector<128x128xf32>, vector<1x128xf32> -> vector<1x128xf32>
    %c0_13 = arith.constant 0 : index
    %c0_14 = arith.constant 0 : index
    %21 = vector.load %arg5[%c0_13, %c0_14] : memref<1x128xf32, #tpu.memory_space<vmem>>, vector<1x128xf32>
    %22 = arith.addf %20, %21 : vector<1x128xf32>
    %cst_15 = arith.constant 0.000000e+00 : f32
    %23 = vector.broadcast %cst_15 : f32 to vector<1x128xf32>
    %24 = arith.subf %23, %22 : vector<1x128xf32>
    %25 = math.exp %24 : vector<1x128xf32>
    %cst_16 = arith.constant 1.000000e+00 : f32
    %26 = vector.broadcast %cst_16 : f32 to vector<1x128xf32>
    %27 = arith.addf %26, %25 : vector<1x128xf32>
    %28 = tpu.reciprocal %27 {approx = true} : vector<1x128xf32> -> vector<1x128xf32>
    %29 = vector.shape_cast %28 : vector<1x128xf32> to vector<1x1x128xf32>
    %30 = vector.broadcast %29 : vector<1x1x128xf32> to vector<1x64x128xf32>
    %31 = arith.mulf %1, %30 : vector<1x64x128xf32>
    %32 = arith.truncf %31 : vector<1x64x128xf32> to vector<1x64x128xbf16>
    %c0_17 = arith.constant 0 : index
    %c0_18 = arith.constant 0 : index
    %c0_19 = arith.constant 0 : index
    %33 = vector.load %arg6[%c0_17, %c0_18, %c0_19] : memref<1x64x128xbf16, #tpu.memory_space<vmem>>, vector<1x64x128xbf16>
    tpu.vector_store %arg6[%c0_17, %c0_18, %c0_19], %32 {strides = array<i32>} : memref<1x64x128xbf16, #tpu.memory_space<vmem>>, vector<1x64x128xbf16>,
    return
  }
  func.func @transform_0(%arg0: i32) -> (i32, i32, i32) {
    %c0_i32 = arith.constant 0 : i32
    %c0_i32_0 = arith.constant 0 : i32
    %c0_i32_1 = arith.constant 0 : i32
    return %arg0, %c0_i32, %c0_i32_0 : i32, i32, i32
  }
  func.func @transform_1(%arg0: i32) -> (i32, i32) {
    %c0_i32 = arith.constant 0 : i32
    %c0_i32_0 = arith.constant 0 : i32
    %c0_i32_1 = arith.constant 0 : i32
    return %c0_i32, %c0_i32_0 : i32, i32
  }
  func.func @transform_2(%arg0: i32) -> (i32, i32) {
    %c0_i32 = arith.constant 0 : i32
    %c0_i32_0 = arith.constant 0 : i32
    %c0_i32_1 = arith.constant 0 : i32
    return %c0_i32, %c0_i32_0 : i32, i32
  }
  func.func @transform_3(%arg0: i32) -> (i32, i32) {
    %c0_i32 = arith.constant 0 : i32
    %c0_i32_0 = arith.constant 0 : i32
    %c0_i32_1 = arith.constant 0 : i32
    return %c0_i32, %c0_i32_0 : i32, i32
  }
  func.func @transform_4(%arg0: i32) -> (i32, i32) {
    %c0_i32 = arith.constant 0 : i32
    %c0_i32_0 = arith.constant 0 : i32
    %c0_i32_1 = arith.constant 0 : i32
    return %c0_i32, %c0_i32_0 : i32, i32
  }
  func.func @transform_5(%arg0: i32) -> (i32, i32, i32) {
    %c0_i32 = arith.constant 0 : i32
    %c0_i32_0 = arith.constant 0 : i32
    %c0_i32_1 = arith.constant 0 : i32
    return %arg0, %c0_i32, %c0_i32_0 : i32, i32, i32
  }
}

</mosaic_0001>

<bundles_post_ra>
// kernel: tpu_custom_call.1
= control target key start
LH: loop header
LB: loop body
LE: loop exit
PB: predicated region body
PF: predicated region fallthrough
CT: control target
= control target key end

     0   :  { %10 = vsyncpa [#allocation3], 0  ;;  %s1483_s0 = inlined_call_operand.hbm [shape: bf16[2,64,128], index: 0, kind: input, shape index: {}]   ;;  %s1484_s1 = inlined_call_operand.hbm [shape: f32[128,128], index: 1, kind: input, shape index: {}]   ;;  %s1485_s2 = inlined_call_operand.vmem [shape: f32[1,128], index: 2, kind: input, shape index: {}]   ;;  %s1486_s3 = inlined_call_operand.hbm [shape: f32[128,128], index: 3, kind: input, shape index: {}]   ;;  %s1487_s4 = inlined_call_operand.vmem [shape: f32[1,128], index: 4, kind: input, shape index: {}]   ;;  %s1488_s5 = inlined_call_operand.hbm [shape: bf16[2,64,128], index: 5, kind: output, shape index: {}]  }
   0x1   :  { %12 = vsyncpa [#allocation3 + $0x1], 0 }
   0x2   :  { %13 = vsyncpa [#allocation6], 0 }
   0x3   :  { %14 = vsyncpa [#allocation4], 0 }
   0x4   :  { %16 = vsyncpa [#allocation4 + $0x1], 0  ;;  %s1167_s18 = smov 0   ;;  %s1169_s19 = smov 0  }
   0x5   :  { %s1171_s20 = smov 0   ;;  %s1173_s21 = smov 0  }
   0x6 LB: > { %s1188_s22 = sadd.s32 4294967295, %s1122_s21   ;;  %s652_s23 = sadd.s32 4294967294, %s1122_s21   ;;  %s1122_s21 = sphi %s1173_s21, %s1508_s21   ;;  %s1118_s20 = sphi %s1171_s20, %s1507_s20   ;;  %s1114_s19 = sphi %s1169_s19, %s1506_s19   ;;  %s1110_s18 = sphi %s1167_s18, %s1505_s18  }
   0x7   : > { %p42_p0 = scmp.ne.s32.totalorder %s1114_s19, %s1110_s18  ;;  %p1489_p1 = scmp.eq.s32.totalorder %s1188_s22, 0 }
   0x8   : > { %p156_p3 = scmp.eq.s32.totalorder %s652_s23, 1  ;;  %p653_p5 = scmp.ge.s32.totalorder %s1122_s21, 1 }
   0x9   : > { %p1197_p4 = por %p1489_p1, %p42_p0  ;;  %p163_p7 = scmp.lt.s32.totalorder %s1122_s21, 3 }
   0xa   : > { %p1202_p6 = por %p156_p3, %p42_p0  ;;  %s1124_s27 = smov [#allocation5]  }
   0xb   : > { %s1492_s24 = scalar_select %p1197_p4, 1, 0 }
   0xc   : > { %s1493_s25 = scalar_select %p1202_p6, 1, 0 }
   0xd   : > { %p1207_p8 = pnand %p653_p5, %p163_p7  ;;  %s175_s28 = sshll.u32 %s1124_s27, 4  ;;  %s1211_s28 = int_to_ptr.vmem [resolvable:$true] %s175_s28 }
   0xe   : > { %s1125_s30 = smov [#allocation7]   ;;  %s966_s9 = scalar_lea.hbm %s1484_s1, 2048 }
   0xf   : > { %p894_p9 = pneg %p1207_p8  ;;  %s191_s6 = sshll.u32 %s1125_s30, 4  ;;  %s1222_s6 = int_to_ptr.vmem [resolvable:$true] %s191_s6 }
  0x10   : > { %p967_p12 = scmp.ne.s32.totalorder %s1484_s1, %s966_s9  ;;  %p973_p5 = scmp.lt.u32.totalorder %s966_s9, %s1484_s1 }
  0x11   : > { %p1218_p11 = pnand %p894_p9, %p1489_p1 }
  0x13   : > { %p968_p13 = pneg %p1218_p11 }
  0x15   : > { %p969_p0 = pnand %p968_p13, %p967_p12 }
  0x17   : > { %p970_p3 = pneg %p969_p0 }
  0x19   : > { %p975_p7 = pnand %p973_p5, %p970_p3 }
  0x1b   : > { %978 = shalt.err (!%p975_p7)
}
  0x1c   : > { %s979_s14 = scalar_lea.vmem %s1211_s28, 2048  ;;  %p987_p2 = scmp.lt.s32.totalorder %s1211_s28, %s1211_s28 }
  0x1d   : > { %p980_p9 = scmp.ne.s32.totalorder %s1211_s28, %s979_s14  ;;  %p988_p12 = scmp.lt.s32.totalorder %s979_s14, %s979_s14 }
  0x1f   : > { %p982_p10 = pnand %p980_p9, %p968_p13  ;;  %p989_p0 = por %p988_p12, %p987_p2 }
  0x21   : > { %p983_p1 = pneg %p982_p10 }
  0x23   : > { %p990_p6 = pnand %p989_p0, %p983_p1 }
  0x25   : > { %993 = shalt.err (!%p990_p6)
}
  0x26   : > { %s1126_s15 = smov 128   ;;  %s1127_s16 = smov 8  }
  0x27   : > { %897 = dma.hbm_to_vmem [thread:$0]  (!%p1218_p11), %s1484_s1, 2048, %s1211_s28, [#allocation6], %s1126_s15, %s1126_s15, %s1127_s16  }
  0x28   : > { %s994_s7 = scalar_lea.hbm %s1486_s3, 2048 }
  0x29   : > { %p995_p2 = scmp.ne.s32.totalorder %s1486_s3, %s994_s7  ;;  %p1001_p10 = scmp.lt.u32.totalorder %s994_s7, %s1486_s3 }
  0x2b   : > { %p997_p1 = pnand %p995_p2, %p968_p13 }
  0x2d   : > { %p998_p6 = pneg %p997_p1 }
  0x2f   : > { %p1003_p3 = pnand %p1001_p10, %p998_p6 }
  0x31   : > { %1006 = shalt.err (!%p1003_p3)
}
  0x32   : > { %s1007_s28 = scalar_lea.vmem %s1222_s6, 2048  ;;  %p1015_p12 = scmp.lt.s32.totalorder %s1222_s6, %s1222_s6 }
  0x33   : > { %p1008_p5 = scmp.ne.s32.totalorder %s1222_s6, %s1007_s28  ;;  %p1016_p0 = scmp.lt.s32.totalorder %s1007_s28, %s1007_s28 }
  0x35   : > { %p1010_p7 = pnand %p1008_p5, %p968_p13  ;;  %p1017_p2 = por %p1016_p0, %p1015_p12 }
  0x37   : > { %p1011_p9 = pneg %p1010_p7 }
  0x39   : > { %p1018_p1 = pnand %p1017_p2, %p1011_p9 }
  0x3b   : > { %1021 = shalt.err (!%p1018_p1)
}
  0x3c   : > { %900 = dma.hbm_to_vmem [thread:$0]  (!%p1218_p11), %s1486_s3, 2048, %s1222_s6, [#allocation6], %s1126_s15, %s1126_s15, %s1127_s16  }
  0x3d   : > { %s1277_s14 = sadd.s32 1, %s1122_s21   ;;  %s29_s29 = sadd.s32 1, %s1118_s20 }
  0x3e   : > { %s26_s17 = ssub.s32 %s1122_s21, %s1277_s14  ;;  %p36_p13 = scmp.ne.s32.totalorder %s1118_s20, %s1114_s19 }
  0x3f   : > { %p27_p6 = scmp.eq.s32.totalorder %s26_s17, 0  ;;  %p37_p10 = scmp.eq.s32.totalorder %s1122_s21, 0 }
  0x40   : > { %p1496_p3 = scmp.eq.s32.totalorder %s1188_s22, 1  ;;  %p911_p7 = scmp.lt.s32.totalorder %s1122_s21, 2 }
  0x41   : > { %s1293_s27 = scalar_select %p27_p6, %s1118_s20, %s29_s29  }
  0x42   : > { %p1287_p5 = por %p1496_p3, %p36_p13  ;;  %p38_p9 = por %p37_p10, %p36_p13 }
  0x43   : > { %s208_s30 = sand.u32 1, %s1118_s20   ;;  %s678_s6 = sshll.u32 %s1122_s21, 9 }
  0x44   : > { %s1497_s23 = scalar_select %p1287_p5, 1, 0 }
  0x45   : > { %s657_s7 = sshll.u32 %s208_s30, 5  ;;  %s1300_s8 = scalar_lea.hbm %s1483_s0, %s678_s6 }
  0x46   : > { %s212_s9 = scalar_lea.vmem [#allocation2], %s657_s7  ;;  %p1304_p11 = pnand %p911_p7, %p38_p9 }
  0x47   : > { %s219_s10 = sshll.u32 %s212_s9, 4  ;;  %s1308_s28 = scalar_lea.sflag [#allocation3], %s208_s30  ;;  %s1302_s10 = int_to_ptr.vmem [resolvable:$true] %s219_s10 }
  0x48   : > { %s1022_s12 = scalar_lea.hbm %s1300_s8, 512  ;;  %p1024_p0 = pneg %p1304_p11 }
  0x49   : > { %p1023_p12 = scmp.ne.s32.totalorder %s1300_s8, %s1022_s12  ;;  %s1027_s17 = scalar_lea.hbm %s1483_s0, 1024 }
  0x4a   : > { %p1028_p13 = scmp.lt.u32.totalorder %s1300_s8, %s1483_s0  ;;  %p1029_p6 = scmp.lt.u32.totalorder %s1027_s17, %s1022_s12 }
  0x4b   : > { %p1025_p2 = pnand %p1024_p0, %p1023_p12  ;;  %p1031_p3 = scmp.lt.u32.totalorder %s1022_s12, %s1300_s8 }
  0x4c   : > { %p1030_p10 = por %p1029_p6, %p1028_p13 }
  0x4d   : > { %p1026_p1 = pneg %p1025_p2 }
  0x4e   : > { %p1032_p7 = por %p1031_p3, %p1030_p10 }
  0x50   : > { %p1033_p9 = pnand %p1032_p7, %p1026_p1 }
  0x52   : > { %1036 = shalt.err (!%p1033_p9)
}
  0x53   : > { %s1037_s30 = scalar_lea.vmem %s1302_s10, 512  ;;  %s1128_s15 = smov [#allocation2]  }
  0x54   : > { %p1038_p12 = scmp.ne.s32.totalorder %s1302_s10, %s1037_s30  ;;  %s1042_s16 = sshll.u32 %s1128_s15, 4  ;;  %s1043_s16 = int_to_ptr.vmem [resolvable:$false] %s1042_s16 }
  0x55   : > { %s1044_s9 = scalar_lea.vmem %s1043_s16, 1024  ;;  %p1045_p4 = scmp.lt.s32.totalorder %s1302_s10, %s1043_s16 }
  0x56   : > { %p1040_p2 = pnand %p1038_p12, %p1024_p0  ;;  %p1046_p13 = scmp.lt.s32.totalorder %s1044_s9, %s1037_s30 }
  0x58   : > { %p1041_p5 = pneg %p1040_p2  ;;  %p1047_p6 = por %p1046_p13, %p1045_p4 }
  0x5a   : > { %p1048_p10 = pnand %p1047_p6, %p1041_p5 }
  0x5c   : > { %1051 = shalt.err (!%p1048_p10)
}
  0x5d   : > { %s1129_s12 = smov 64   ;;  %s1130_s13 = smov 4  }
  0x5e   : > { %904 = dma.hbm_to_vmem [thread:$0]  (!%p1304_p11), %s1300_s8, 512, %s1302_s10, %s1308_s28, %s1129_s12, %s1129_s12, %s1130_s13  }
  0x5f   : > { %231 = sbr.rel (%p1207_p8) target bundleno = 932 (0x3a4), region = 40  ;;  %s1339_s29 = sand.u32 (!%p1207_p8), 1, %s1114_s19  }
  0x60   : > { %s661_s17 = sshll.u32 (!%p1207_p8), %s1339_s29, 5  ;;  %s234_s7 = scalar_lea.sflag (!%p1207_p8), [#allocation3], %s1339_s29 }
  0x61   : > { %s1345_s6 = scalar_lea.vmem (!%p1207_p8), [#allocation2], %s661_s17  ;;  %p1499_p4 = scmp.ne.s32.totalorder (!%p1207_p8), %s1492_s24, 0 }
  0x66   : > { %1097 = dma.done.wait (%p1499_p4), %s234_s7, 512  }
  0x67   : > { %1099 = vsyncadd (%p1499_p4), %s234_s7, 4294966784  ;;  %p1500_p5 = scmp.eq.s32.totalorder %s1188_s22, 0 }
  0x69   : > { %1101 = dma.done.wait (%p1500_p5), [#allocation6], 4096   ;;  %p1501_p8 = pmov %p1500_p5 }
  0x6a   : > { %v1131_v0 = vmov 0.0|0.0   ;;  %vm1132_vm0 = vmmov 0   ;;  %v1133_v1 = vmov 0.0   ;;  %v303_v2 = vld [vmem:[#allocation5] sm:$0xff]  ;;  %v304_v3 = vld [vmem:[#allocation5 + $0x8] sm:$0xff]  ;;  %v305_v4 = vld [vmem:[#allocation5 + $0x10] sm:$0xff] }
  0x6b   : > { %1103 = vsyncadd (%p1501_p8), [#allocation6], 4294963200  ;;  %834 = vmatprep.subr.bf16.mxu0 %v1131_v0  ;;  %796 = vmatprep.mubr.msk.f32.mxu0 %vm1132_vm0, %v1133_v1  ;;  %v835_v5 = vpack.c.bf16 %v304_v3, %v303_v2  ;;  %v306_v6 = vld [vmem:[#allocation5 + $0x18] sm:$0xff]  ;;  %v307_v8 = vld [vmem:[#allocation5 + $0x20] sm:$0xff]  ;;  %vm390_vm1 = vcmask 1040384   ;;  %s687_s11 = sshll.u32 %s1188_s22, 9 }
  0x6c   : > { %858 = vmatprep.subr.bf16.mxu1 %v1131_v0  ;;  %831 = vmatprep.mubr.msk.f32.mxu1 %vm1132_vm0, %v1133_v1  ;;  %v838_v7 = vpack.c.bf16 %v306_v6, %v305_v4  ;;  %v308_v9 = vld [vmem:[#allocation5 + $0x28] sm:$0xff]  ;;  %v1359_v10 = vld [vmem:[%s1345_s6] sm:$0xff]   ;;  %v1368_v16 = vld [vmem:[%s1345_s6 + $0x10] sm:$0xff]   ;;  %s271_s28 = scalar_lea.vmem [#allocation8], %s661_s17  ;;  %s1437_s16 = scalar_lea.hbm %s1488_s5, %s687_s11 }
  0x6d   : > { %836 = vmatpush3.bf16.msra.mxu0 %v835_v5  ;;  %v1362_v11 = vld [vmem:[%s1345_s6 + $0x8] sm:$0xff]   ;;  %v690_v12 = vunpack.c.l.bf16 %v1359_v10  ;;  %v691_v13 = vunpack.c.h.bf16 %v1359_v10  ;;  %v841_v15 = vpack.c.bf16 %v308_v9, %v307_v8  ;;  %v309_v17 = vld [vmem:[#allocation5 + $0x30] sm:$0xff]  ;;  %v310_v18 = vld [vmem:[#allocation5 + $0x38] sm:$0xff]  ;;  %v698_v21 = vunpack.c.l.bf16 %v1368_v16  ;;  %s560_s30 = sshll.u32 %s271_s28, 4  ;;  %s547_s9 = scalar_lea.sflag [#allocation4], %s1339_s29  ;;  %s1439_s30 = int_to_ptr.vmem [resolvable:$true] %s560_s30 }
  0x6e   : > { %837 = vmatprep.subr.bf16.mxu0 %v1131_v0  ;;  %v694_v14 = vunpack.c.l.bf16 %v1362_v11  ;;  %v695_v19 = vunpack.c.h.bf16 %v1362_v11  ;;  %v844_v23 = vpack.c.bf16 %v310_v18, %v309_v17  ;;  %v1380_v24 = vld [vmem:[%s1345_s6 + $0x18] sm:$0xff]   ;;  %v311_v25 = vld [vmem:[#allocation5 + $0x40] sm:$0xff]  ;;  %v312_v26 = vld [vmem:[#allocation5 + $0x48] sm:$0xff]  ;;  %v699_v27 = vunpack.c.h.bf16 %v1368_v16  ;;  %s1052_s12 = scalar_lea.vmem %s1439_s30, 512  ;;  %p1502_p0 = scmp.ne.s32.totalorder %s1497_s23, 0 }
  0x6f   : > { %v288_v20 = vadd.f32 %v691_v13, %v690_v12  ;;  %v702_v29 = vunpack.c.l.bf16 %v1380_v24  ;;  %v847_v31 = vpack.c.bf16 %v312_v26, %v311_v25  ;;  %v313_v32 = vld [vmem:[#allocation5 + $0x50] sm:$0xff]  ;;  %v314_v33 = vld [vmem:[#allocation5 + $0x58] sm:$0xff]  ;;  %v703_v34 = vunpack.c.h.bf16 %v1380_v24  ;;  %v315_v38 = vld [vmem:[#allocation5 + $0x60] sm:$0xff]  ;;  %p1053_p11 = scmp.ne.s32.totalorder %s1439_s30, %s1052_s12  ;;  %s1134_s13 = smov [#allocation8]  }
  0x70   : > { %v850_v37 = vpack.c.bf16 %v314_v33, %v313_v32  ;;  %v316_v39 = vld [vmem:[#allocation5 + $0x68] sm:$0xff]  ;;  %v317_v43 = vld [vmem:[#allocation5 + $0x70] sm:$0xff]  ;;  %v318_v44 = vld [vmem:[#allocation5 + $0x78] sm:$0xff]  ;;  %s1056_s17 = sshll.u32 %s1134_s13, 4  ;;  %s1057_s17 = int_to_ptr.vmem [resolvable:$false] %s1056_s17 }
  0x71   : > { %839 = vmatpush3.bf16.msra.mxu0 %v838_v7  ;;  %v289_v22 = vadd.f32 %v694_v14, %v288_v20  ;;  %v853_v42 = vpack.c.bf16 %v316_v39, %v315_v38  ;;  %v856_v47 = vpack.c.bf16 %v318_v44, %v317_v43  ;;  %v319_v52 = vld [vmem:[%s1485_s2] sm:$0x1]  ;;  %v403_v58 = vld [vmem:[#allocation7 + $0x8] sm:$0xff]  ;;  %v404_v59 = vld [vmem:[#allocation7 + $0x10] sm:$0xff]  ;;  %p1054_p1 = pnand %p1053_p11, %p1502_p0  ;;  %s1058_s7 = scalar_lea.vmem %s1057_s17, 1024 }
  0x72   : > { %840 = vmatprep.subr.bf16.mxu0 %v1131_v0  ;;  %v402_v57 = vld [vmem:[#allocation7] sm:$0xff]  ;;  %v405_v61 = vld [vmem:[#allocation7 + $0x18] sm:$0xff]  ;;  %v407_v1 = vld [vmem:[#allocation7 + $0x28] sm:$0xff]  ;;  %p1059_p7 = scmp.lt.s32.totalorder %s1439_s30, %s1057_s17  ;;  %p1060_p9 = scmp.lt.s32.totalorder %s1058_s7, %s1052_s12 }
  0x73   : > { %v290_v28 = vadd.f32 %v695_v19, %v289_v22  ;;  %v859_v60 = vpack.c.bf16 %v403_v58, %v402_v57  ;;  %v862_v62 = vpack.c.bf16 %v405_v61, %v404_v59  ;;  %v406_v63 = vld [vmem:[#allocation7 + $0x20] sm:$0xff]  ;;  %v408_v3 = vld [vmem:[#allocation7 + $0x30] sm:$0xff]  ;;  %v409_v4 = vld [vmem:[#allocation7 + $0x38] sm:$0xff]  ;;  %p1055_p3 = pneg %p1054_p1 }
  0x74   : > { %v865_v2 = vpack.c.bf16 %v407_v1, %v406_v63  ;;  %v868_v5 = vpack.c.bf16 %v409_v4, %v408_v3  ;;  %v410_v6 = vld [vmem:[#allocation7 + $0x40] sm:$0xff]  ;;  %v411_v7 = vld [vmem:[#allocation7 + $0x48] sm:$0xff]  ;;  %v412_v22 = vld [vmem:[#allocation7 + $0x50] sm:$0xff]  ;;  %p1061_p12 = por %p1060_p9, %p1059_p7 }
  0x75   : > { %842 = vmatpush3.bf16.msra.mxu0 %v841_v15  ;;  %v291_v30 = vadd.f32 %v698_v21, %v290_v28  ;;  %860 = vmatpush3.bf16.msra.mxu1 %v859_v60  ;;  %v871_v8 = vpack.c.bf16 %v411_v7, %v410_v6  ;;  %v414_v26 = vld [vmem:[#allocation7 + $0x60] sm:$0xff]  ;;  %v415_v28 = vld [vmem:[#allocation7 + $0x68] sm:$0xff]  ;;  %v417_v32 = vld [vmem:[#allocation7 + $0x78] sm:$0xff] }
  0x76   : > { %843 = vmatprep.subr.bf16.mxu0 %v1131_v0  ;;  %861 = vmatprep.subr.bf16.mxu1 %v1131_v0  ;;  %v418_v38 = vld [vmem:[%s1487_s4] sm:$0x1]  ;;  %p1062_p2 = pnand %p1061_p12, %p1055_p3 }
  0x77   : > { %v292_v35 = vadd.f32 %v699_v27, %v291_v30  ;;  %v877_v30 = vpack.c.bf16 %v415_v28, %v414_v26 }
  0x79   : > { %845 = vmatpush3.bf16.msra.mxu0 %v844_v23  ;;  %v293_v36 = vadd.f32 %v702_v29, %v292_v35  ;;  %863 = vmatpush3.bf16.msra.mxu1 %v862_v62  ;;  %v413_v23 = vld [vmem:[#allocation7 + $0x58] sm:$0xff] }
  0x7a   : > { %846 = vmatprep.subr.bf16.mxu0 %v1131_v0  ;;  %864 = vmatprep.subr.bf16.mxu1 %v1131_v0  ;;  %v874_v25 = vpack.c.bf16 %v413_v23, %v412_v22 }
  0x7b   : > { %v294_v40 = vadd.f32 %v703_v34, %v293_v36 }
  0x7d   : > { %848 = vmatpush3.bf16.msra.mxu0 %v847_v31  ;;  %v295_v41 = vrot.slane %v294_v40, 4  ;;  %866 = vmatpush3.bf16.msra.mxu1 %v865_v2  ;;  %v416_v31 = vld [vmem:[#allocation7 + $0x70] sm:$0xff] }
  0x7e   : > { %849 = vmatprep.subr.bf16.mxu0 %v1131_v0  ;;  %867 = vmatprep.subr.bf16.mxu1 %v1131_v0  ;;  %v880_v33 = vpack.c.bf16 %v417_v32, %v416_v31 }
  0x7f   : > { %v296_v45 = vadd.f32 %v295_v41, %v294_v40 }
  0x81   : > { %851 = vmatpush3.bf16.msra.mxu0 %v850_v37  ;;  %v297_v46 = vrot.slane %v296_v45, 2  ;;  %869 = vmatpush3.bf16.msra.mxu1 %v868_v5 }
  0x82   : > { %852 = vmatprep.subr.bf16.mxu0 %v1131_v0  ;;  %870 = vmatprep.subr.bf16.mxu1 %v1131_v0 }
  0x83   : > { %v298_v48 = vadd.f32 %v297_v46, %v296_v45  ;;  %v494_v45 = vlaneseq }
  0x85   : > { %854 = vmatpush3.bf16.msra.mxu0 %v853_v42  ;;  %v299_v49 = vrot.slane %v298_v48, 1  ;;  %872 = vmatpush3.bf16.msra.mxu1 %v871_v8  ;;  %v495_v46 = vshrl.u32 %v494_v45, 7 }
  0x86   : > { %855 = vmatprep.subr.bf16.mxu0 %v1131_v0  ;;  %873 = vmatprep.subr.bf16.mxu1 %v1131_v0 }
  0x87   : > { %v300_v50 = vadd.f32 %v299_v49, %v298_v48 }
  0x89   : > { %857 = vmatpush3.bf16.msra.mxu0 %v856_v47  ;;  %v302_v51 = vmul.f32 0.015625, %v300_v50  ;;  %875 = vmatpush3.bf16.msra.mxu1 %v874_v25  ;;  %v496_v47 = vsub.s32 0, %v495_v46 }
  0x8a   : > { %876 = vmatprep.subr.bf16.mxu1 %v1131_v0 }
  0x8c   : > { %797 = vmatmul.mubr.f32.vlgmr.msra.gmra.mrb[0].mxu0 %v302_v51 }
  0x8d   : > { %878 = vmatpush3.bf16.msra.mxu1 %v877_v30 }
  0x8e   : > { %879 = vmatprep.subr.bf16.mxu1 %v1131_v0 }
  0x91   : > { %881 = vmatpush3.bf16.msra.mxu1 %v880_v33 }
 0x15f   : > { %v386_v53 = vpop.f32.mrb[0].mxu0 }
 0x160   : > { %v387_v54 = vadd.f32 %v386_v53, %v319_v52  ;;  %v798_v55 = vpop.f32.mrb[1].mxu0 }
 0x162   : > { %v391_v56 = vsel %vm390_vm1, %v387_v54, -inf }
 0x163   : > { %392 = vmax.xlane.f32.xlu0 %v391_v56 }
 0x1f0   : > { %v393_v9 = vpop.xlane.xlu0 %392 }
 0x1f1   : > { %v394_v15 = vsub.f32 %v387_v54, %v393_v9 }
 0x1f3   : > { %v395_v17 = vmul.f32 1.442695, %v394_v15 }
 0x1f5   : > { %958 = vpow2.f32 %v395_v17 }
 0x1ff   : > { %v959_v18 = vpop.eup %958 }
 0x200   : > { %v397_v20 = vsel %vm390_vm1, %v959_v18, 0.0 }
 0x201   : > { %398 = vadd.xlane.f32.xlu0 %v397_v20 }
 0x28e   : > { %v399_v35 = vpop.xlane.xlu0 %398 }
 0x28f   : > { %960 = vrcp.f32 %v399_v35 }
 0x299   : > { %v961_v36 = vpop.eup %960 }
 0x29a   : > { %v401_v37 = vmul.f32 %v961_v36, %v959_v18 }
 0x29c   : > { %832 = vmatmul.mubr.f32.vlgmr.msra.gmra.mrb[0].mxu1 %v401_v37 }
 0x36f   : > { %v485_v39 = vpop.f32.mrb[0].mxu1 }
 0x370   : > { %v486_v40 = vadd.f32 %v485_v39, %v418_v38  ;;  %v833_v41 = vpop.f32.mrb[1].mxu1 }
 0x372   : > { %v489_v42 = vsub.f32 0.0, %v486_v40 }
 0x374   : > { %v490_v43 = vmul.f32 1.442695, %v489_v42 }
 0x376   : > { %962 = vpow2.f32 %v490_v43 }
 0x380   : > { %v963_v44 = vpop.eup %962 }
 0x381   : > { %v492_v0 = vadd.f32 1.0, %v963_v44 }
 0x383   : > { %964 = vrcp.f32 %v492_v0 }
 0x38d   : > { %v965_v48 = vpop.eup %964 }
 0x38e   : > { %v497_v49 = vrot.slane %v965_v48, %v496_v47 }
 0x390   : > { %v498_v50 = vmul.f32 %v690_v12, %v497_v49  ;;  %v499_v51 = vmul.f32 %v691_v13, %v497_v49  ;;  %v500_v52 = vmul.f32 %v694_v14, %v497_v49  ;;  %v501_v53 = vmul.f32 %v695_v19, %v497_v49 }
 0x391   : > { %v502_v54 = vmul.f32 %v698_v21, %v497_v49  ;;  %v503_v55 = vmul.f32 %v699_v27, %v497_v49  ;;  %v504_v12 = vmul.f32 %v702_v29, %v497_v49  ;;  %v505_v10 = vmul.f32 %v703_v34, %v497_v49 }
 0x392   : > { %v707_v13 = vpack.c.bf16 %v499_v51, %v498_v50  ;;  %v712_v56 = vpack.c.bf16 %v501_v53, %v500_v52 }
 0x393   : > { %v717_v11 = vpack.c.bf16 %v503_v55, %v502_v54  ;;  %v722_v14 = vpack.c.bf16 %v505_v10, %v504_v12 }
 0x394   : > { %708 = vst [vmem:[%s271_s28] sm:$0xff] %v707_v13   ;;  %727 = vst [vmem:[%s271_s28 + $0x8] sm:$0xff] %v712_v56  }
 0x395   : > { %728 = vst [vmem:[%s271_s28 + $0x10] sm:$0xff] %v717_v11   ;;  %729 = vst [vmem:[%s271_s28 + $0x18] sm:$0xff] %v722_v14  }
 0x396   : > { %1065 = shalt.err (!%p1062_p2)
}
 0x397   : > { %s1066_s6 = scalar_lea.hbm %s1437_s16, 512  ;;  %s1070_s8 = scalar_lea.hbm %s1488_s5, 1024 }
 0x398   : > { %p1067_p13 = scmp.ne.s32.totalorder %s1437_s16, %s1066_s6  ;;  %p1071_p4 = scmp.lt.u32.totalorder %s1437_s16, %s1488_s5 }
 0x399   : > { %p1072_p5 = scmp.lt.u32.totalorder %s1070_s8, %s1066_s6  ;;  %p1074_p11 = scmp.lt.u32.totalorder %s1066_s6, %s1437_s16 }
 0x39a   : > { %p1068_p6 = pnand %p1067_p13, %p1502_p0 }
 0x39b   : > { %p1073_p8 = por %p1072_p5, %p1071_p4 }
 0x39c   : > { %p1069_p10 = pneg %p1068_p6 }
 0x39d   : > { %p1075_p1 = por %p1074_p11, %p1073_p8 }
 0x39f   : > { %p1076_p3 = pnand %p1075_p1, %p1069_p10 }
 0x3a1   : > { %1079 = shalt.err (!%p1076_p3)
}
 0x3a2   : > { %s1135_s28 = smov 64   ;;  %s1136_s22 = smov 4  }
 0x3a3   : > { %892 = dma.vmem_to_hbm [thread:$0]  (%p1502_p0), %s1439_s30, 512, %s1437_s16, %s547_s9, %s1135_s28, %s1135_s28, %s1136_s22  }
 0x3a4 PF: > { %s575_s15 = sand.u32 1, %s1110_s18   ;;  %p1503_p7 = scmp.ne.s32.totalorder %s1493_s25, 0 }
 0x3a5   : > { %p1504_p9 = scmp.ge.s32.totalorder %s1122_s21, 2  ;;  %s576_s12 = scalar_lea.sflag [#allocation4], %s575_s15 }
 0x3a7   : > { %p906_p12 = pnand %p1504_p9, %p1503_p7 }
 0x3a9   : > { %1105 = dma.done.wait (!%p906_p12), %s576_s12, 512  }
 0x3aa   : > { %1107 = vsyncadd (!%p906_p12), %s576_s12, 4294966784  ;;  %p19_p2 = scmp.ge.s32.totalorder %s1277_s14, 4   ;;  %s1505_s18 = smov %s1114_s19 }
 0x3ab   : > { %s1506_s19 = smov %s1118_s20  ;;  %s1507_s20 = smov %s1293_s27 }
 0x3ac   : > { %s1508_s21 = smov %s1277_s14  ;;  %21 = sbr.rel (!%p19_p2) target bundleno = 6 (0x6), region = 93 }
 0x3b3   :  { %581 = vsyncpa [#allocation3], 1 }
 0x3b4   :  { %583 = vsyncpa [#allocation3 + $0x1], 1 }
 0x3b5   :  { %584 = vsyncpa [#allocation6], 1 }
 0x3b6   :  { %585 = vsyncpa [#allocation4], 1 }
 0x3b7   :  { %587 = vsyncpa [#allocation4 + $0x1], 1 }

</bundles_post_ra>
